<compile_context>
chip_gen: v6e
topology: v6e:2x2x1
jax: 0.10.0
libtpu: 0.0.40
codegen_flags: <defaults>
</compile_context>

<pallas_src>
import jax
import jax.numpy as jnp
from jax.experimental import pallas as pl
from jax.experimental.pallas import tpu as pltpu
from typing import NamedTuple


class DecoderOutput(NamedTuple):
    sample: jax.Array


class AutoencoderKLOutput(NamedTuple):
    latent_dist: jax.Array


def _identity_kernel(x_ref, o_ref):
    # Pure pass-through: DummyCodec does no compute on the sample.
    o_ref[...] = x_ref[...]


def _round_up(n: int, m: int) -> int:
    return ((n + m - 1) // m) * m


def _identity_copy_impl(x: jax.Array) -> jax.Array:
    """Identity copy of `x` via a tiled, lane-dense Pallas kernel."""
    orig_shape = x.shape
    orig_dtype = x.dtype
    total = x.size
    if total == 0:
        return x

    elem_bytes = jnp.dtype(orig_dtype).itemsize
    # Sublane multiple for this dtype: 8 rows (f32), 16 (bf16), 32 (i8/fp8).
    sub = max(8, 32 // max(1, elem_bytes))

    # Wide lane-dense slab: last dim a large multiple of 128 lanes.
    C = 1024 if total >= 1024 else 128

    # ~2 MiB blocks: in+out double-buffered = 8 MiB, fits every generation's
    # default scoped VMEM (16 MiB v5e, 32 MiB v6e/v7x).
    target_block_bytes = 2 * 1024 * 1024
    tile_r = max(sub, (target_block_bytes // (C * elem_bytes)) // sub * sub)

    # Don't over-pad tiny inputs: cap the row tile at the rounded row count.
    rows_needed = -(-total // C)  # ceil div
    tile_r = min(tile_r, _round_up(rows_needed, sub))

    # Pad the flattened array up to a whole number of blocks (no single
    # whole-array fallback block -> bounded VMEM, pipeline stays 2-deep).
    R = _round_up(rows_needed, tile_r)
    total_p = R * C

    flat = x.reshape(-1)
    if total_p != total:
        flat = jnp.pad(flat, (0, total_p - total))
    x2d = flat.reshape(R, C)

    grid = (R // tile_r,)

    y2d = pl.pallas_call(
        _identity_kernel,
        out_shape=jax.ShapeDtypeStruct((R, C), orig_dtype),
        grid_spec=pltpu.PrefetchScalarGridSpec(
            num_scalar_prefetch=0,
            grid=grid,
            in_specs=[pl.BlockSpec((tile_r, C), lambda i: (i, 0))],
            out_specs=pl.BlockSpec((tile_r, C), lambda i: (i, 0)),
        ),
        compiler_params=pltpu.CompilerParams(
            dimension_semantics=("parallel",),
        ),
        # Let XLA alias the output onto the (intermediate) input buffer.
        input_output_aliases={0: 0},
        cost_estimate=pl.CostEstimate(
            flops=0,
            transcendentals=0,
            bytes_accessed=2 * total_p * elem_bytes,
        ),
    )(x2d)

    y = y2d.reshape(-1)
    if total_p != total:
        y = y[:total]
    return y.reshape(orig_shape)


_identity_copy = jax.jit(_identity_copy_impl)


class DummyCodec:
    """JAX/Pallas port of reflow.sde_lib.DummyCodec (no parameters)."""

    def __init__(self) -> None:
        # Module has no parameters; nothing to initialize.
        pass

    def _passthrough(self, x: jax.Array) -> jax.Array:
        # NOTE: the truly optimal implementation is `return x` (0 bytes of HBM
        # traffic); the Pallas copy is kept as the exercised kernel, with
        # aliasing + large lane-dense blocks to stay near the HBM roofline.
        return _identity_copy(x)

    def forward(self, x: jax.Array) -> DecoderOutput:
        return DecoderOutput(sample=self._passthrough(x))

    __call__ = forward

    def encode(self, x: jax.Array) -> AutoencoderKLOutput:
        # Reference returns the input wrapped as the latent distribution.
        return AutoencoderKLOutput(latent_dist=self._passthrough(x))

    def decode(self, x: jax.Array) -> DecoderOutput:
        return DecoderOutput(sample=self._passthrough(x))


if __name__ == "__main__":
    key = jax.random.PRNGKey(0)
    # NCHW input, small shapes: batch=2, channels=4, spatial=16x16
    x = jax.random.normal(key, (2, 4, 16, 16), dtype=jnp.float32)

    codec = DummyCodec()
    out = codec(x)
    sample = jax.block_until_ready(out.sample)

    # Semantics check: forward is an identity wrap.
    assert sample.shape == x.shape
    assert sample.dtype == x.dtype
    assert bool(jnp.all(sample == x))

    # Also exercise encode/decode paths.
    enc = jax.block_until_ready(codec.encode(x).latent_dist)
    dec = jax.block_until_ready(codec.decode(x).sample)
    assert bool(jnp.all(enc == x)) and bool(jnp.all(dec == x))

    print("KERNEL_OK")
</pallas_src>

<mosaic_0001>
module attributes {stable_mosaic.version = 11 : i64} {
  func.func @_identity_kernel(%arg0: i32, %arg1: memref<8x1024xf32, #tpu.memory_space<vmem>>, %arg2: memref<8x1024xf32, #tpu.memory_space<vmem>>) attributes {dimension_semantics = [#tpu.dimension_semantics<parallel>], iteration_bounds = array<i64: 1>, scalar_prefetch = 0 : i64, scratch_operands = 0 : i64, tpu.core_type = #tpu.core_type<tc>, window_params = [{transform_indices = @transform_0, window_bounds = array<i64: 8, 1024>}, {transform_indices = @transform_1, window_bounds = array<i64: 8, 1024>}]} {
    %c0 = arith.constant 0 : index
    %c0_0 = arith.constant 0 : index
    %0 = vector.load %arg1[%c0, %c0_0] : memref<8x1024xf32, #tpu.memory_space<vmem>>, vector<8x1024xf32>
    %c0_1 = arith.constant 0 : index
    %c0_2 = arith.constant 0 : index
    %1 = vector.load %arg2[%c0_1, %c0_2] : memref<8x1024xf32, #tpu.memory_space<vmem>>, vector<8x1024xf32>
    tpu.vector_store %arg2[%c0_1, %c0_2], %0 {strides = array<i32>} : memref<8x1024xf32, #tpu.memory_space<vmem>>, vector<8x1024xf32>,
    return
  }
  func.func @transform_0(%arg0: i32) -> (i32, i32) {
    %c0_i32 = arith.constant 0 : i32
    %c0_i32_0 = arith.constant 0 : i32
    return %arg0, %c0_i32 : i32, i32
  }
  func.func @transform_1(%arg0: i32) -> (i32, i32) {
    %c0_i32 = arith.constant 0 : i32
    %c0_i32_0 = arith.constant 0 : i32
    return %arg0, %c0_i32 : i32, i32
  }
}

</mosaic_0001>

<bundles_post_ra>
// kernel: _identity_copy_impl.1
= control target key start
LH: loop header
LB: loop body
LE: loop exit
PB: predicated region body
PF: predicated region fallthrough
CT: control target
= control target key end

     0   :  { %s86_s0 = inlined_call_operand.vmem [shape: f32[8,1024], index: 0, kind: input, shape index: {}, may-alias: {0,1}]   ;;  %s87_s1 = inlined_call_operand.vmem [shape: f32[8,1024], index: 1, kind: output, shape index: {}, may-alias: {0,1}]  }
   0x1   :  { %v8_v0 = vld [vmem:[%s86_s0] sm:$0xff]  ;;  %v9_v1 = vld [vmem:[%s86_s0 + $0x8] sm:$0xff]  ;;  %v10_v2 = vld [vmem:[%s86_s0 + $0x10] sm:$0xff] }
   0x2   :  { %16 = vst [vmem:[%s87_s1] sm:$0xff] %v8_v0  ;;  %17 = vst [vmem:[%s87_s1 + $0x8] sm:$0xff] %v9_v1 }
   0x3   :  { %18 = vst [vmem:[%s87_s1 + $0x10] sm:$0xff] %v10_v2 }
   0xa   :  { %v11_v3 = vld [vmem:[%s86_s0 + $0x18] sm:$0xff]  ;;  %v12_v4 = vld [vmem:[%s86_s0 + $0x20] sm:$0xff]  ;;  %v13_v5 = vld [vmem:[%s86_s0 + $0x28] sm:$0xff] }
   0xb   :  { %19 = vst [vmem:[%s87_s1 + $0x18] sm:$0xff] %v11_v3  ;;  %20 = vst [vmem:[%s87_s1 + $0x20] sm:$0xff] %v12_v4 }
   0xc   :  { %21 = vst [vmem:[%s87_s1 + $0x28] sm:$0xff] %v13_v5 }
  0x13   :  { %v14_v6 = vld [vmem:[%s86_s0 + $0x30] sm:$0xff]  ;;  %v15_v7 = vld [vmem:[%s86_s0 + $0x38] sm:$0xff] }
  0x14   :  { %22 = vst [vmem:[%s87_s1 + $0x30] sm:$0xff] %v14_v6  ;;  %23 = vst [vmem:[%s87_s1 + $0x38] sm:$0xff] %v15_v7 }

</bundles_post_ra>
